<compile_context>
chip_gen: v7x
topology: tpu7x:2x2x1
jax: 0.10.0
libtpu: 0.0.40
codegen_flags: <defaults>
</compile_context>

<pallas_src>
import functools

import jax
import jax.numpy as jnp
import numpy as np
from jax import lax
from jax.experimental import pallas as pl
from jax.experimental.pallas import tpu as pltpu

_LANES = 128
_SUBLANES = 8
# (8192,128) f32 = 4 MiB / buffer -> 8 MiB double-buffered.
_MAX_BLOCK_ROWS_F32 = 8192
# Leading "parallel" grid axis: 2 TensorCores on v7x, neutral on v5e/v6e.
_NUM_CORES = 2


def _cdiv(a, b):
    return -(-a // b)


def _round_up(a, b):
    return _cdiv(a, b) * b


def _elementwise_loss(xf, gan_type, target_val, bf16_softplus):
    """Per-element loss in f32 (VPU / EUP work only)."""
    if gan_type in ("gan", "ragan"):
        # BCEWithLogitsLoss with constant target t (numerically stable form):
        #   max(x, 0) - x*t + log1p(exp(-|x|))
        t = jnp.float32(target_val)
        neg_abs = -jnp.abs(xf)
        if bf16_softplus:
            # Halve the EUP cost of exp/log1p; accumulation stays f32.
            sp = jnp.log1p(jnp.exp(neg_abs.astype(jnp.bfloat16))).astype(
                jnp.float32)
        else:
            sp = jnp.log1p(jnp.exp(neg_abs))
        return jnp.maximum(xf, 0.0) - xf * t + sp
    elif gan_type == "lsgan":
        d = xf - jnp.float32(target_val)
        return d * d
    elif gan_type == "wgan-gp":
        return xf
    raise NotImplementedError(f"GAN type [{gan_type}] is not found")


def _ganloss_partial_kernel(x_ref, o_ref, *, gan_type, target_val,
                            bf16_softplus, rows_valid, rows_per_core,
                            block_rows, need_mask):
    c = pl.program_id(0)   # core (parallel axis)
    i = pl.program_id(1)   # block within the core's row range (reduction axis)

    @pl.when(i == 0)
    def _init():
        o_ref[...] = jnp.zeros_like(o_ref)

    x = x_ref[...].astype(jnp.float32)        # (block_rows, 128)

    def _accumulate(elem):
        # Full-vreg accumulation: (block_rows,128) -> (8,128) with VPU vreg
        # adds only; cross-lane/sublane reduce happens once in the wrapper.
        partial = elem.reshape(block_rows // _SUBLANES, _SUBLANES,
                               _LANES).sum(axis=0)
        o_ref[...] += partial[None, :, :]

    if need_mask:
        blk_start = c * rows_per_core + i * block_rows   # logical row offset
        full = blk_start + block_rows <= rows_valid

        @pl.when(full)
        def _hot():
            _accumulate(_elementwise_loss(x, gan_type, target_val,
                                          bf16_softplus))

        @pl.when(jnp.logical_not(full))
        def _tail():
            rows_iota = lax.broadcasted_iota(jnp.int32, x.shape, 0)
            mask = (blk_start + rows_iota) < rows_valid
            # Mask x before the transcendentals (the undefined region of a
            # ragged / duplicated block must never reach exp/log1p), then
            # mask the elementwise loss itself.
            xm = jnp.where(mask, x, 0.0)
            elem = jnp.where(
                mask, _elementwise_loss(xm, gan_type, target_val,
                                        bf16_softplus), 0.0)
            _accumulate(elem)
    else:
        _accumulate(_elementwise_loss(x, gan_type, target_val, bf16_softplus))


class GANLossPallas:
    """JAX/Pallas port of GANLoss.forward (returns a scalar f32)."""

    def __init__(self, gan_type, real_label_val=1.0, fake_label_val=0.0,
                 label_smooth=False, flood_level=0.0):
        if label_smooth:
            assert real_label_val == 1
        self.gan_type = gan_type.lower()
        if self.gan_type not in ("gan", "ragan", "lsgan", "wgan-gp"):
            raise NotImplementedError(
                "GAN type [{:s}] is not found".format(self.gan_type))
        self.real_label_val = float(real_label_val)
        self.fake_label_val = float(fake_label_val)
        self.smooth_window = 0.1 if label_smooth else 0.0
        self.flood_level = float(flood_level)

    def _target_value(self, target_is_real, is_updating_d):
        if target_is_real:
            if is_updating_d:
                return self.real_label_val - self.smooth_window
            return self.real_label_val
        return self.fake_label_val

    def __call__(self, x, target_is_real, is_updating_D=False):
        gan_type = self.gan_type
        if gan_type == "wgan-gp":
            sign = -1.0 if target_is_real else 1.0
            target_val = 0.0  # unused
        else:
            sign = 1.0
            target_val = self._target_value(target_is_real, is_updating_D)

        bf16_softplus = (gan_type in ("gan", "ragan")
                         and x.dtype == jnp.bfloat16)

        n_valid = int(np.prod(x.shape))
        flat = jnp.ravel(x)          # NCHW row-major, native dtype (no upcast)

        rows = n_valid // _LANES
        if rows < _SUBLANES:
            rows = 0                 # degenerate tiny input: pure-JAX path
        kernel_elems = rows * _LANES

        total = jnp.float32(0.0)
        if rows > 0:
            x2d = (flat if kernel_elems == n_valid
                   else flat[:kernel_elems]).reshape(rows, _LANES)

            itemsize = int(jnp.dtype(x.dtype).itemsize)
            max_rows = _MAX_BLOCK_ROWS_F32 * max(1, 4 // max(itemsize, 1))

            # Split the rows across _NUM_CORES contiguous ranges; tile each
            # range with block_rows (multiple of 8, <= ~4 MiB per buffer).
            rows_half = _cdiv(rows, _NUM_CORES)
            bpc = _cdiv(rows_half, max_rows)            # blocks per core
            block_rows = min(max_rows,
                             _round_up(_cdiv(rows_half, bpc), _SUBLANES))
            rows_per_core = bpc * block_rows
            total_blocks = _cdiv(rows, block_rows)
            need_mask = (_NUM_CORES * rows_per_core != rows)

            if _NUM_CORES * bpc > total_blocks:
                # Rare: the last core's final block would start past the end.
                # Clamp its block index (it re-reads the previous block, which
                # the in-kernel row mask then fully excludes).
                last = total_blocks - 1

                def in_map(c, i, _bpc=bpc, _last=last):
                    return (jnp.minimum(c * _bpc + i, _last), 0)
            else:
                def in_map(c, i, _bpc=bpc):
                    return (c * _bpc + i, 0)

            kernel = functools.partial(
                _ganloss_partial_kernel,
                gan_type=gan_type,
                target_val=target_val,
                bf16_softplus=bf16_softplus,
                rows_valid=rows,
                rows_per_core=rows_per_core,
                block_rows=block_rows,
                need_mask=need_mask,
            )

            partials = pl.pallas_call(
                kernel,
                out_shape=jax.ShapeDtypeStruct(
                    (_NUM_CORES, _SUBLANES, _LANES), jnp.float32),
                grid_spec=pltpu.PrefetchScalarGridSpec(
                    num_scalar_prefetch=0,
                    grid=(_NUM_CORES, bpc),
                    in_specs=[pl.BlockSpec((block_rows, _LANES), in_map)],
                    out_specs=pl.BlockSpec((1, _SUBLANES, _LANES),
                                           lambda c, i: (c, 0, 0)),
                ),
                compiler_params=pltpu.CompilerParams(
                    dimension_semantics=("parallel", "arbitrary")),
            )(x2d)
            total = jnp.sum(partials)

        if kernel_elems != n_valid:
            # <=127-element lane remainder (or a degenerate tiny input):
            # handled in plain JAX, no full-tensor pad copy.
            tail = flat[kernel_elems:].astype(jnp.float32)
            total = total + jnp.sum(
                _elementwise_loss(tail, gan_type, target_val, bf16_softplus))

        loss = jnp.float32(sign) * (total / jnp.float32(n_valid))
        if is_updating_D:
            fl = jnp.float32(self.flood_level)
            loss = jnp.abs(loss - fl) + fl
        return loss


def _reference(x, gan_type, target_is_real, is_updating_D, real_label_val=1.0,
               fake_label_val=0.0, label_smooth=False, flood_level=0.0):
    """Pure-JAX reference mirroring the PyTorch module."""
    x = x.astype(jnp.float32)
    smooth = 0.1 if label_smooth else 0.0
    if gan_type == "wgan-gp":
        loss = -jnp.mean(x) if target_is_real else jnp.mean(x)
    else:
        if target_is_real:
            t = real_label_val - smooth if is_updating_D else real_label_val
        else:
            t = fake_label_val
        if gan_type in ("gan", "ragan"):
            loss = jnp.mean(jnp.maximum(x, 0.0) - x * t
                            + jnp.log1p(jnp.exp(-jnp.abs(x))))
        else:  # lsgan
            loss = jnp.mean((x - t) ** 2)
    if is_updating_D:
        loss = jnp.abs(loss - flood_level) + flood_level
    return loss


if __name__ == "__main__":
    key = jax.random.PRNGKey(0)

    cases = [
        # primary shape: small NCHW discriminator logits, exactly lane-aligned
        dict(shape=(2, 4, 16, 16), gan_type="gan", label_smooth=True,
             flood_level=0.05, target_is_real=True, is_updating_D=True),
        dict(shape=(2, 4, 16, 16), gan_type="lsgan", label_smooth=False,
             flood_level=0.0, target_is_real=False, is_updating_D=False),
        dict(shape=(2, 4, 16, 16), gan_type="wgan-gp", label_smooth=False,
             flood_level=0.0, target_is_real=True, is_updating_D=False),
        # PatchGAN-like output: lane remainder (wrapper tail) + ragged block
        dict(shape=(1, 3, 70, 70), gan_type="gan", label_smooth=False,
             flood_level=0.0, target_is_real=True, is_updating_D=False),
        # clean 2-way core split, no masking anywhere
        dict(shape=(2, 1, 512, 300), gan_type="ragan", label_smooth=False,
             flood_level=0.02, target_is_real=False, is_updating_D=True),
        # lane remainder + ragged last core block together
        dict(shape=(1, 3, 321, 321), gan_type="lsgan", label_smooth=False,
             flood_level=0.0, target_is_real=True, is_updating_D=False),
        # rows == 8: exercises the clamped / fully-masked duplicate block path
        dict(shape=(2, 4, 8, 16), gan_type="gan", label_smooth=False,
             flood_level=0.0, target_is_real=True, is_updating_D=False),
        # multiple blocks per core (bpc > 1, grid (2, 2))
        dict(shape=(1, 9, 512, 512), gan_type="ragan", label_smooth=False,
             flood_level=0.02, target_is_real=False, is_updating_D=True),
        # bf16 logits: exercises the bf16-EUP softplus path (looser tolerance)
        dict(shape=(2, 4, 16, 16), gan_type="gan", label_smooth=False,
             flood_level=0.0, target_is_real=True, is_updating_D=False,
             dtype=jnp.bfloat16, rtol=3e-2, atol=1e-3),
    ]

    for c in cases:
        key, sub = jax.random.split(key)
        dtype = c.get("dtype", jnp.float32)
        x = jax.random.normal(sub, c["shape"], dtype=dtype)
        mod = GANLossPallas(c["gan_type"], real_label_val=1.0,
                            fake_label_val=0.0,
                            label_smooth=c["label_smooth"],
                            flood_level=c["flood_level"])
        got = mod(x, c["target_is_real"], is_updating_D=c["is_updating_D"])
        got = jax.block_until_ready(got)
        want = _reference(x, c["gan_type"], c["target_is_real"],
                          c["is_updating_D"], label_smooth=c["label_smooth"],
                          flood_level=c["flood_level"])
        np.testing.assert_allclose(np.asarray(got), np.asarray(want),
                                   rtol=c.get("rtol", 1e-4),
                                   atol=c.get("atol", 1e-6))

    print("KERNEL_OK")
</pallas_src>

<mosaic_0001>
module attributes {stable_mosaic.version = 11 : i64} {
  func.func @_ganloss_partial_kernel(%arg0: i32, %arg1: i32, %arg2: memref<8x128xf32, #tpu.memory_space<vmem>>, %arg3: memref<1x8x128xf32, #tpu.memory_space<vmem>>) attributes {dimension_semantics = [#tpu.dimension_semantics<parallel>, #tpu.dimension_semantics<arbitrary>], iteration_bounds = array<i64: 2, 1>, scalar_prefetch = 0 : i64, scratch_operands = 0 : i64, tpu.core_type = #tpu.core_type<tc>, window_params = [{transform_indices = @transform_0, window_bounds = array<i64: 8, 128>}, {transform_indices = @transform_1, window_bounds = array<i64: 1, 8, 128>}]} {
    %c0_i32 = arith.constant 0 : i32
    %0 = arith.cmpi eq, %arg1, %c0_i32 : i32
    %1 = arith.extui %0 : i1 to i32
    %c0_i32_0 = arith.constant 0 : i32
    %2 = arith.cmpi ne, %1, %c0_i32_0 : i32
    scf.if %2 {
      %cst_11 = arith.constant 0.000000e+00 : f32
      %21 = vector.broadcast %cst_11 : f32 to vector<1x8x128xf32>
      %c0_12 = arith.constant 0 : index
      %c0_13 = arith.constant 0 : index
      %c0_14 = arith.constant 0 : index
      %22 = vector.load %arg3[%c0_12, %c0_13, %c0_14] : memref<1x8x128xf32, #tpu.memory_space<vmem>>, vector<1x8x128xf32>
      tpu.vector_store %arg3[%c0_12, %c0_13, %c0_14], %21 {strides = array<i32>} : memref<1x8x128xf32, #tpu.memory_space<vmem>>, vector<1x8x128xf32>,
    } else {
    }
    %c0 = arith.constant 0 : index
    %c0_1 = arith.constant 0 : index
    %3 = vector.load %arg2[%c0, %c0_1] : memref<8x128xf32, #tpu.memory_space<vmem>>, vector<8x128xf32>
    %4 = math.absf %3 : vector<8x128xf32>
    %cst = arith.constant 0.000000e+00 : f32
    %5 = vector.broadcast %cst : f32 to vector<8x128xf32>
    %6 = arith.subf %5, %4 : vector<8x128xf32>
    %7 = math.exp %6 : vector<8x128xf32>
    %8 = math.log1p %7 : vector<8x128xf32>
    %cst_2 = arith.constant 0.000000e+00 : f32
    %9 = vector.broadcast %cst_2 : f32 to vector<8x128xf32>
    %10 = arith.maximumf %3, %9 : vector<8x128xf32>
    %cst_3 = arith.constant 0.899999976 : f32
    %11 = vector.broadcast %cst_3 : f32 to vector<8x128xf32>
    %12 = arith.mulf %3, %11 : vector<8x128xf32>
    %13 = arith.subf %10, %12 : vector<8x128xf32>
    %14 = arith.addf %13, %8 : vector<8x128xf32>
    %15 = vector.shape_cast %14 : vector<8x128xf32> to vector<1x8x128xf32>
    %cst_4 = arith.constant dense<0.000000e+00> : vector<8x128xf32>
    %16 = vector.multi_reduction <add>, %15, %cst_4 [0] : vector<1x8x128xf32> to vector<8x128xf32>
    %c0_5 = arith.constant 0 : index
    %c0_6 = arith.constant 0 : index
    %c0_7 = arith.constant 0 : index
    %17 = vector.load %arg3[%c0_5, %c0_6, %c0_7] : memref<1x8x128xf32, #tpu.memory_space<vmem>>, vector<1x8x128xf32>
    %18 = vector.shape_cast %16 : vector<8x128xf32> to vector<1x8x128xf32>
    %19 = arith.addf %17, %18 : vector<1x8x128xf32>
    %c0_8 = arith.constant 0 : index
    %c0_9 = arith.constant 0 : index
    %c0_10 = arith.constant 0 : index
    %20 = vector.load %arg3[%c0_8, %c0_9, %c0_10] : memref<1x8x128xf32, #tpu.memory_space<vmem>>, vector<1x8x128xf32>
    tpu.vector_store %arg3[%c0_8, %c0_9, %c0_10], %19 {strides = array<i32>} : memref<1x8x128xf32, #tpu.memory_space<vmem>>, vector<1x8x128xf32>,
    return
  }
  func.func @transform_0(%arg0: i32, %arg1: i32) -> (i32, i32) {
    %c1_i32 = arith.constant 1 : i32
    %0 = arith.muli %arg0, %c1_i32 : i32
    %1 = arith.addi %0, %arg1 : i32
    %c0_i32 = arith.constant 0 : i32
    %c0_i32_0 = arith.constant 0 : i32
    return %1, %c0_i32 : i32, i32
  }
  func.func @transform_1(%arg0: i32, %arg1: i32) -> (i32, i32, i32) {
    %c0_i32 = arith.constant 0 : i32
    %c0_i32_0 = arith.constant 0 : i32
    %c0_i32_1 = arith.constant 0 : i32
    return %arg0, %c0_i32, %c0_i32_0 : i32, i32, i32
  }
}

</mosaic_0001>

<bundles_post_ra>
// kernel: tpu_custom_call.1
= control target key start
LH: loop header
LB: loop body
LE: loop exit
PB: predicated region body
PF: predicated region fallthrough
CT: control target
= control target key end

     0   :  { %6 = vsyncpa [#allocation3], 0  ;;  %s646_s0 = inlined_call_operand.hbm [shape: f32[16,128], index: 0, kind: input, shape index: {}]   ;;  %s647_s1 = inlined_call_operand.hbm [shape: f32[2,8,128], index: 1, kind: output, shape index: {}]  }
   0x1   :  { %8 = vsyncpa [#allocation3 + $0x1], 0 }
   0x2   :  { %9 = vsyncpa [#allocation4], 0 }
   0x3   :  { %11 = vsyncpa [#allocation4 + $0x1], 0  ;;  %s474_s6 = smov 0   ;;  %s476_s7 = smov 0  }
   0x4   :  { %s478_s8 = smov 0   ;;  %s480_s9 = smov 0  }
   0x5   :  { %s482_s10 = smov 0   ;;  %s484_s11 = smov 0  }
   0x6 LB: > { %s268_s12 = sadd.s32 4294967295, %s460_s11   ;;  %s269_s13 = sadd.s32 4294967294, %s460_s11   ;;  %s460_s11 = sphi %s484_s11, %s17_s11   ;;  %s456_s10 = sphi %s482_s10, %s663_s10   ;;  %s452_s9 = sphi %s480_s9, %s662_s9   ;;  %s448_s8 = sphi %s478_s8, %s661_s8   ;;  %s444_s7 = sphi %s476_s7, %s660_s7   ;;  %s440_s6 = sphi %s474_s6, %s659_s6  }
   0x7   : > { %s29_s14 = sadd.s32 1, %s456_s10  ;;  %s38_s15 = sadd.s32 1, %s448_s8 }
   0x8   : > { %p31_p0 = scmp.ge.s32.totalorder %s29_s14, 2  ;;  %p45_p1 = scmp.ne.s32.totalorder %s448_s8, %s444_s7 }
   0x9   : > { %p46_p2 = scmp.eq.s32.totalorder %s460_s11, 0  ;;  %p51_p3 = scmp.ne.s32.totalorder %s444_s7, %s440_s6 }
   0xa   : > { %s665_s14 = smov (%p31_p0, %s29_s14), 0  ;;  %p52_p5 = scmp.eq.s32.totalorder %s268_s12, 0 }
   0xb   : > { %p515_p4 = por %p46_p2, %p45_p1  ;;  %s35_s17 = ssub.s32 %s456_s10, %s665_s14 }
   0xc   : > { %p75_p6 = scmp.eq.s32.totalorder %s268_s12, 1  ;;  %p36_p7 = scmp.eq.s32.totalorder %s35_s17, 0 }
   0xd   : > { %p521_p8 = por %p52_p5, %p51_p3  ;;  %p81_p10 = scmp.eq.s32.totalorder %s269_s13, 1 }
   0xe   : > { %p525_p9 = por %p75_p6, %p45_p1  ;;  %p293_p13 = scmp.lt.s32.totalorder %s460_s11, 2 }
   0xf   : > { %s530_s20 = scalar_select %p36_p7, %s448_s8, %s38_s15  }
  0x10   : > { %s651_s19 = scalar_select %p525_p9, 1, 0 }
  0x11   : > { %p532_p11 = por %p81_p10, %p51_p3  ;;  %s101_s22 = sand.u32 1, %s448_s8  }
  0x12   : > { %s272_s23 = sshll.u32 %s101_s22, 3  ;;  %s273_s24 = sshll.u32 %s456_s10, 7 }
  0x13   : > { %s652_s21 = scalar_select %p532_p11, 1, 0 }
  0x14   : > { %s543_s27 = scalar_lea.hbm %s646_s0, %s273_s24  ;;  %s105_s28 = scalar_lea.vmem [#allocation2], %s272_s23 }
  0x15   : > { %s113_s29 = sshll.u32 %s105_s28, 4  ;;  %p549_p0 = pnand %p293_p13, %p515_p4  ;;  %s545_s29 = int_to_ptr.vmem [resolvable:$true] %s113_s29 }
  0x16   : > { %s102_s2 = scalar_lea.sflag [#allocation3], %s101_s22  ;;  %s348_s3 = scalar_lea.hbm %s543_s27, 128 }
  0x17   : > { %p349_p3 = scmp.ne.s32.totalorder %s543_s27, %s348_s3  ;;  %p350_p5 = pneg %p549_p0 }
  0x18   : > { %s353_s12 = scalar_lea.hbm %s646_s0, 256  ;;  %p354_p4 = scmp.lt.u32.totalorder %s543_s27, %s646_s0 }
  0x19   : > { %p351_p6 = pnand %p350_p5, %p349_p3  ;;  %p355_p10 = scmp.lt.u32.totalorder %s353_s12, %s348_s3 }
  0x1a   : > { %p357_p12 = scmp.lt.u32.totalorder %s348_s3, %s543_s27 }
  0x1b   : > { %p352_p7 = pneg %p351_p6  ;;  %p356_p13 = por %p355_p10, %p354_p4 }
  0x1d   : > { %p358_p1 = por %p357_p12, %p356_p13 }
  0x1f   : > { %p359_p2 = pnand %p358_p1, %p352_p7 }
  0x21   : > { %362 = shalt.err (!%p359_p2)
}
  0x22   : > { %s363_s16 = scalar_lea.vmem %s545_s29, 128  ;;  %s462_s17 = smov [#allocation2]  }
  0x23   : > { %p364_p3 = scmp.ne.s32.totalorder %s545_s29, %s363_s16  ;;  %s368_s22 = sshll.u32 %s462_s17, 4  ;;  %s369_s22 = int_to_ptr.vmem [resolvable:$false] %s368_s22 }
  0x24   : > { %s370_s23 = scalar_lea.vmem %s369_s22, 256  ;;  %p371_p9 = scmp.lt.s32.totalorder %s545_s29, %s369_s22 }
  0x25   : > { %p366_p6 = pnand %p364_p3, %p350_p5  ;;  %p372_p4 = scmp.lt.s32.totalorder %s370_s23, %s363_s16 }
  0x27   : > { %p367_p11 = pneg %p366_p6  ;;  %p373_p10 = por %p372_p4, %p371_p9 }
  0x29   : > { %p374_p12 = pnand %p373_p10, %p367_p11 }
  0x2b   : > { %377 = shalt.err (!%p374_p12)
}
  0x2c   : > { %288 = dma.hbm_to_vmem [thread:$0]  (!%p549_p0), %s543_s27, 128, %s545_s29, %s102_s2  }
  0x2d   : > { %p654_p1 = scmp.lt.s32.totalorder %s460_s11, 3  ;;  %p655_p2 = scmp.ge.s32.totalorder %s460_s11, 1 }
  0x2f   : > { %p119_p5 = pnand %p655_p2, %p654_p1 }
  0x30   : > { %s585_s24 = sand.u32 (!%p119_p5), 1, %s444_s7  }
  0x31   : > { %122 = sbr.rel (%p119_p5) target bundleno = 107 (0x6b), region = 24  ;;  %s275_s25 = sshll.u32 (!%p119_p5), %s585_s24, 3 }
  0x32   : > { %s125_s26 = scalar_lea.sflag (!%p119_p5), [#allocation3], %s585_s24  ;;  %s128_s28 = scalar_lea.vmem (!%p119_p5), [#allocation2], %s275_s25 }
  0x38   : > { %431 = dma.done.wait (%p521_p8), %s125_s26, 128  }
  0x39   : > { %433 = vsyncadd (%p521_p8), %s125_s26, 4294967168  ;;  %v153_v0 = vld [vmem:[%s128_s28] sm:$0xff]  ;;  %s278_s18 = sshll.u32 %s452_s9, 7  ;;  %s146_s27 = scalar_lea.vmem [#allocation5], %s275_s25 }
  0x3a   : > { %v154_v1 = vand.u32 2147483647, %v153_v0  ;;  %v167_v9 = vmax.f32 %v153_v0, 0.0  ;;  %v168_v10 = vmul.f32 0.9, %v153_v0  ;;  %s189_s29 = sshll.u32 %s146_s27, 4  ;;  %s597_s3 = scalar_lea.hbm %s647_s1, %s278_s18  ;;  %s599_s29 = int_to_ptr.vmem [resolvable:$true] %s189_s29 }
  0x3b   : > { %s176_s4 = scalar_lea.sflag [#allocation4], %s585_s24  ;;  %s378_s5 = scalar_lea.vmem %s599_s29, 128 }
  0x3c   : > { %v155_v2 = vsub.f32 0.0, %v154_v1  ;;  %v169_v13 = vsub.f32 %v167_v9, %v168_v10  ;;  %p379_p8 = scmp.ne.s32.totalorder %s599_s29, %s378_s5  ;;  %p656_p9 = scmp.ne.s32.totalorder %s651_s19, 0 }
  0x3d   : > { %s463_s9 = smov [#allocation5]  }
  0x3e   : > { %v156_v3 = vmul.f32 1.442695, %v155_v2  ;;  %p380_p11 = pnand %p379_p8, %p656_p9  ;;  %s382_s12 = sshll.u32 %s463_s9, 4  ;;  %s383_s12 = int_to_ptr.vmem [resolvable:$false] %s382_s12 }
  0x3f   : > { %s384_s13 = scalar_lea.vmem %s383_s12, 256  ;;  %p385_p7 = scmp.lt.s32.totalorder %s599_s29, %s383_s12 }
  0x40   : > { %344 = vpow2.f32 %v156_v3  ;;  %p381_p0 = pneg %p380_p11  ;;  %p386_p13 = scmp.lt.s32.totalorder %s384_s13, %s378_s5 }
  0x42   : > { %p387_p3 = por %p386_p13, %p385_p7 }
  0x44   : > { %p388_p6 = pnand %p387_p3, %p381_p0 }
  0x4a   : > { %v345_v4 = vpop.eup %344 }
  0x4b   : > { %v158_v5 = vadd.f32 1.0, %v345_v4  ;;  %v161_v6 = vmul.f32 -0.5, %v345_v4  ;;  %v164_v8 = vand.u32 2147483647, %v345_v4 }
  0x4d   : > { %346 = vlog2.f32 %v158_v5  ;;  %v162_v7 = vadd.f32 1.0, %v161_v6  ;;  %vm165_vm0 = vcmp.lt.f32.partialorder %v164_v8, 0.0004427343 }
  0x4f   : > { %v163_v11 = vmul.f32 %v345_v4, %v162_v7 }
  0x57   : > { %v347_v12 = vpop.eup %346 }
  0x58   : > { %v160_v14 = vmul.f32 0.6931472, %v347_v12 }
  0x5a   : > { %v166_v15 = vsel %vm165_vm0, %v163_v11, %v160_v14 }
  0x5b   : > { %v170_v16 = vadd.f32 %v169_v13, %v166_v15 }
  0x5d   : > { %174 = vst [vmem:[%s146_s27] sm:$0xff] %v170_v16 }
  0x5e   : > { %391 = shalt.err (!%p388_p6)
}
  0x5f   : > { %s392_s15 = scalar_lea.hbm %s597_s3, 128  ;;  %s396_s22 = scalar_lea.hbm %s647_s1, 256 }
  0x60   : > { %p393_p4 = scmp.ne.s32.totalorder %s597_s3, %s392_s15  ;;  %p397_p1 = scmp.lt.u32.totalorder %s597_s3, %s647_s1 }
  0x61   : > { %p398_p2 = scmp.lt.u32.totalorder %s396_s22, %s392_s15  ;;  %p400_p8 = scmp.lt.u32.totalorder %s392_s15, %s597_s3 }
  0x62   : > { %p394_p10 = pnand %p393_p4, %p656_p9 }
  0x63   : > { %p399_p5 = por %p398_p2, %p397_p1 }
  0x64   : > { %p395_p12 = pneg %p394_p10 }
  0x65   : > { %p401_p11 = por %p400_p8, %p399_p5 }
  0x67   : > { %p402_p0 = pnand %p401_p11, %p395_p12 }
  0x69   : > { %405 = shalt.err (!%p402_p0)
}
  0x6a   : > { %283 = dma.vmem_to_hbm [thread:$0]  (%p656_p9), %s599_s29, 128, %s597_s3, %s176_s4  }
  0x6b PF: > { %s201_s25 = sand.u32 1, %s440_s6   ;;  %p657_p7 = scmp.ne.s32.totalorder %s652_s21, 0 }
  0x6c   : > { %p658_p13 = scmp.ge.s32.totalorder %s460_s11, 2  ;;  %s202_s26 = scalar_lea.sflag [#allocation4], %s201_s25 }
  0x6e   : > { %p290_p3 = pnand %p658_p13, %p657_p7 }
  0x70   : > { %435 = dma.done.wait (!%p290_p3), %s202_s26, 128  }
  0x71   : > { %437 = vsyncadd (!%p290_p3), %s202_s26, 4294967168  ;;  %s17_s11 = sadd.s32 1, %s460_s11   ;;  %s659_s6 = smov %s444_s7 }
  0x72   : > { %p14_p6 = scmp.ge.s32.totalorder %s17_s11, 4   ;;  %s660_s7 = smov %s448_s8 }
  0x73   : > { %s661_s8 = smov %s530_s20  ;;  %s662_s9 = smov %s456_s10 }
  0x74   : > { %s663_s10 = smov %s665_s14  ;;  %16 = sbr.rel (!%p14_p6) target bundleno = 6 (0x6), region = 73 }
  0x7b   :  { %207 = vsyncpa [#allocation3], 1 }
  0x7c   :  { %209 = vsyncpa [#allocation3 + $0x1], 1 }
  0x7d   :  { %210 = vsyncpa [#allocation4], 1 }
  0x7e   :  { %212 = vsyncpa [#allocation4 + $0x1], 1 }

</bundles_post_ra>
